<compile_context>
chip_gen: v6e
topology: v6e:2x2x1
jax: 0.10.0
libtpu: 0.0.40
codegen_flags: <defaults>
</compile_context>

<pallas_src>
import functools
import math

import jax
import jax.numpy as jnp
from jax.experimental import pallas as pl
from jax.experimental.pallas import tpu as pltpu


# ----------------------------------------------------------------------------
# helpers
# ----------------------------------------------------------------------------
def _gelu_tanh(x):
    c = 0.7978845608028654  # sqrt(2/pi)
    return 0.5 * x * (1.0 + jnp.tanh(c * (x + 0.044715 * x * x * x)))


def _pick_tile(dim, candidates):
    for c in candidates:
        if c <= dim and dim % c == 0:
            return c
    return dim


def _pad_rows(x, multiple):
    m = x.shape[0]
    pad = (-m) % multiple
    if pad:
        x = jnp.pad(x, ((0, pad), (0, 0)))
    return x, m


# ----------------------------------------------------------------------------
# fused linear kernel:  y = act( LN?(x) @ W + b ) [+ residual]
#   bf16 MXU inputs, f32 VMEM accumulator, bf16 output.
# ----------------------------------------------------------------------------
def _linear_kernel(*refs, activation, has_bias, has_ln, has_residual, nk, eps):
    it = iter(refs)
    x_ref = next(it)
    w_ref = next(it)
    b_ref = next(it) if has_bias else None
    if has_ln:
        g_ref = next(it)
        bt_ref = next(it)
    r_ref = next(it) if has_residual else None
    o_ref = next(it)
    acc_ref = next(it)

    @pl.when(pl.program_id(2) == 0)
    def _init():
        acc_ref[...] = jnp.zeros_like(acc_ref)

    x = x_ref[...]                                    # bf16 (tm, tk)
    if has_ln:
        # LN fused into the GEMM prologue (only valid when tk == K, enforced by wrapper).
        xf = x.astype(jnp.float32)
        mean = jnp.mean(xf, axis=-1, keepdims=True)
        xc = xf - mean
        var = jnp.mean(xc * xc, axis=-1, keepdims=True)
        xf = xc * jax.lax.rsqrt(var + eps) * g_ref[...].astype(jnp.float32) \
             + bt_ref[...].astype(jnp.float32)
        x = xf.astype(jnp.bfloat16)

    acc_ref[...] += jnp.dot(x, w_ref[...], preferred_element_type=jnp.float32)

    @pl.when(pl.program_id(2) == nk - 1)
    def _fini():
        y = acc_ref[...]
        if has_bias:
            y = y + b_ref[...].astype(jnp.float32)
        if activation == "gelu":
            y = _gelu_tanh(y)
        if has_residual:
            y = y + r_ref[...].astype(jnp.float32)
        o_ref[...] = y.astype(o_ref.dtype)


def pallas_linear(x, w, b=None, residual=None, activation=None, ln=None, eps=1e-5):
    m0, K = x.shape
    K2, N = w.shape
    assert K == K2

    x = x.astype(jnp.bfloat16)
    w = w.astype(jnp.bfloat16)

    # Pad rows to a 128-multiple so the MXU gets full-height LHS pushes.
    x, m0 = _pad_rows(x, 128)
    M = x.shape[0]
    if residual is not None:
        residual = _pad_rows(residual.astype(jnp.bfloat16), 128)[0]

    tm = _pick_tile(M, (256, 128))
    tn = _pick_tile(N, (512, 256, 128))
    tk = K if ln is not None else _pick_tile(K, (512, 256, 128))
    nk = K // tk

    has_bias = b is not None
    has_ln = ln is not None
    has_residual = residual is not None

    inputs = [x, w]
    in_specs = [
        pl.BlockSpec((tm, tk), lambda i, j, k: (i, k)),
        pl.BlockSpec((tk, tn), lambda i, j, k: (k, j)),
    ]
    if has_bias:
        inputs.append(b.reshape(1, N).astype(jnp.float32))
        in_specs.append(pl.BlockSpec((1, tn), lambda i, j, k: (0, j)))
    if has_ln:
        g, bt = ln
        inputs += [g.reshape(1, K).astype(jnp.float32),
                   bt.reshape(1, K).astype(jnp.float32)]
        in_specs += [pl.BlockSpec((1, K), lambda i, j, k: (0, 0)),
                     pl.BlockSpec((1, K), lambda i, j, k: (0, 0))]
    if has_residual:
        inputs.append(residual)
        in_specs.append(pl.BlockSpec((tm, tn), lambda i, j, k: (i, j)))

    kernel = functools.partial(
        _linear_kernel, activation=activation, has_bias=has_bias,
        has_ln=has_ln, has_residual=has_residual, nk=nk, eps=eps)

    out = pl.pallas_call(
        kernel,
        out_shape=jax.ShapeDtypeStruct((M, N), jnp.bfloat16),
        grid_spec=pltpu.PrefetchScalarGridSpec(
            num_scalar_prefetch=0,
            grid=(M // tm, N // tn, nk),
            in_specs=in_specs,
            out_specs=pl.BlockSpec((tm, tn), lambda i, j, k: (i, j)),
            scratch_shapes=[pltpu.VMEM((tm, tn), jnp.float32)],
        ),
        compiler_params=pltpu.CompilerParams(
            dimension_semantics=("parallel", "parallel", "arbitrary"),
            vmem_limit_bytes=32 * 1024 * 1024,
        ),
    )(*inputs)
    return out[:m0]


# ----------------------------------------------------------------------------
# standalone LayerNorm kernel (only used for ln_final)
# ----------------------------------------------------------------------------
def _layernorm_kernel(x_ref, g_ref, b_ref, o_ref, *, eps):
    x = x_ref[...].astype(jnp.float32)
    mean = jnp.mean(x, axis=-1, keepdims=True)
    xc = x - mean
    var = jnp.mean(xc * xc, axis=-1, keepdims=True)
    inv = jax.lax.rsqrt(var + eps)
    o_ref[...] = (xc * inv * g_ref[...] + b_ref[...]).astype(o_ref.dtype)


def pallas_layernorm(x, gamma, beta, eps=1e-5):
    x = x.astype(jnp.bfloat16)
    x, m0 = _pad_rows(x, 128)
    M, D = x.shape
    tm = _pick_tile(M, (256, 128))
    kernel = functools.partial(_layernorm_kernel, eps=eps)
    out = pl.pallas_call(
        kernel,
        out_shape=jax.ShapeDtypeStruct((M, D), jnp.bfloat16),
        grid_spec=pltpu.PrefetchScalarGridSpec(
            num_scalar_prefetch=0,
            grid=(M // tm,),
            in_specs=[
                pl.BlockSpec((tm, D), lambda i: (i, 0)),
                pl.BlockSpec((1, D), lambda i: (0, 0)),
                pl.BlockSpec((1, D), lambda i: (0, 0)),
            ],
            out_specs=pl.BlockSpec((tm, D), lambda i: (i, 0)),
        ),
        compiler_params=pltpu.CompilerParams(
            dimension_semantics=("parallel",),
            vmem_limit_bytes=32 * 1024 * 1024,
        ),
    )(x, gamma.reshape(1, D).astype(jnp.float32),
      beta.reshape(1, D).astype(jnp.float32))
    return out[:m0]


# ----------------------------------------------------------------------------
# causal attention kernel: all heads of one batch row per grid step,
# reading the packed (B, S, 3*width) qkv tensor directly (no split/transpose in XLA).
# ----------------------------------------------------------------------------
def _attention_kernel(qkv_ref, o_ref, *, scale, heads, head_dim, width, seq_len):
    qkv = qkv_ref[0]                                     # (S, 3*width) bf16
    row = jax.lax.broadcasted_iota(jnp.int32, (seq_len, seq_len), 0)
    col = jax.lax.broadcasted_iota(jnp.int32, (seq_len, seq_len), 1)
    causal = col <= row

    head_outs = []
    for h in range(heads):
        lo = h * head_dim
        q = qkv[:, lo:lo + head_dim]                             # bf16 (S, D)
        k = qkv[:, width + lo:width + lo + head_dim]             # bf16 (S, D)
        v = qkv[:, 2 * width + lo:2 * width + lo + head_dim]     # bf16 (S, D)

        # scores = q @ k.T on the MXU (bf16 in, f32 out); softmax stays in f32.
        s = jax.lax.dot_general(
            q, k, (((1,), (1,)), ((), ())),
            preferred_element_type=jnp.float32) * scale
        s = jnp.where(causal, s, -1e30)
        m = jnp.max(s, axis=-1, keepdims=True)
        p = jnp.exp(s - m)
        l = jnp.sum(p, axis=-1, keepdims=True)

        out = jnp.dot(p.astype(jnp.bfloat16), v, preferred_element_type=jnp.float32)
        out = out * pl.reciprocal(l, approx=True)        # fold 1/l into (S, D) output
        head_outs.append(out)

    o_ref[0] = jnp.concatenate(head_outs, axis=-1).astype(o_ref.dtype)


def pallas_attention(qkv, scale, heads, width):
    B, S, W3 = qkv.shape
    qkv = qkv.astype(jnp.bfloat16)
    kernel = functools.partial(
        _attention_kernel, scale=scale, heads=heads,
        head_dim=width // heads, width=width, seq_len=S)
    return pl.pallas_call(
        kernel,
        out_shape=jax.ShapeDtypeStruct((B, S, width), jnp.bfloat16),
        grid_spec=pltpu.PrefetchScalarGridSpec(
            num_scalar_prefetch=0,
            grid=(B,),
            in_specs=[pl.BlockSpec((1, S, W3), lambda b: (b, 0, 0))],
            out_specs=pl.BlockSpec((1, S, width), lambda b: (b, 0, 0)),
        ),
        compiler_params=pltpu.CompilerParams(
            dimension_semantics=("parallel",),
            vmem_limit_bytes=32 * 1024 * 1024,
        ),
    )(qkv)


# ----------------------------------------------------------------------------
# plain-JAX reference ops (mirror the kernel math, incl. bf16 storage / MXU inputs)
# ----------------------------------------------------------------------------
def ref_linear(x, w, b=None, residual=None, activation=None, ln=None, eps=1e-5):
    xf = x.astype(jnp.float32)
    if ln is not None:
        g, bb = ln
        mean = jnp.mean(xf, axis=-1, keepdims=True)
        xc = xf - mean
        var = jnp.mean(xc * xc, axis=-1, keepdims=True)
        xf = xc * jax.lax.rsqrt(var + eps) * g.reshape(1, -1) + bb.reshape(1, -1)
    y = jnp.dot(xf.astype(jnp.bfloat16), w.astype(jnp.bfloat16),
                preferred_element_type=jnp.float32)
    if b is not None:
        y = y + b.reshape(1, -1).astype(jnp.float32)
    if activation == "gelu":
        y = _gelu_tanh(y)
    if residual is not None:
        y = y + residual.astype(jnp.float32)
    return y.astype(jnp.bfloat16)


def ref_layernorm(x, gamma, beta, eps=1e-5):
    xf = x.astype(jnp.float32)
    mean = jnp.mean(xf, axis=-1, keepdims=True)
    xc = xf - mean
    var = jnp.mean(xc * xc, axis=-1, keepdims=True)
    y = xc * jax.lax.rsqrt(var + eps) * gamma.reshape(1, -1) + beta.reshape(1, -1)
    return y.astype(jnp.bfloat16)


def ref_attention(qkv, scale, heads, width):
    B, S, _ = qkv.shape
    D = width // heads

    def split(a):
        return a.reshape(B, S, heads, D).transpose(0, 2, 1, 3)  # (B, H, S, D)

    q = split(qkv[..., :width]).astype(jnp.bfloat16)
    k = split(qkv[..., width:2 * width]).astype(jnp.bfloat16)
    v = split(qkv[..., 2 * width:]).astype(jnp.bfloat16)
    s = jnp.einsum("bhqd,bhkd->bhqk", q, k,
                   preferred_element_type=jnp.float32) * scale
    row = jax.lax.broadcasted_iota(jnp.int32, (S, S), 0)
    col = jax.lax.broadcasted_iota(jnp.int32, (S, S), 1)
    s = jnp.where((col <= row)[None, None], s, -1e30)
    p = jax.nn.softmax(s, axis=-1)
    o = jnp.einsum("bhqk,bhkd->bhqd", p.astype(jnp.bfloat16), v,
                   preferred_element_type=jnp.float32)
    return o.transpose(0, 2, 1, 3).reshape(B, S, width).astype(jnp.bfloat16)


# ----------------------------------------------------------------------------
# full encode_text pipeline (identity pooling applied implicitly: no-op)
# ----------------------------------------------------------------------------
def encode_text(tokens, params, *, linear, layernorm, attention):
    B, S = tokens.shape
    width = params["tok_emb"].shape[1]
    H = params["heads"]
    D = width // H
    scale = 1.0 / math.sqrt(D)

    # token embedding + positional embedding (data-dependent gather -> plain JAX)
    x = (jnp.take(params["tok_emb"], tokens, axis=0)
         + params["pos_emb"][None, :S]).astype(jnp.bfloat16)
    x = x.reshape(B * S, width)

    for blk in params["blocks"]:
        # --- causal multi-head self-attention (pre-LN, LN fused into qkv GEMM) ---
        qkv = linear(x, blk["attn_w"], blk["attn_b"], ln=(blk["ln1_g"], blk["ln1_b"]))
        a = attention(qkv.reshape(B, S, 3 * width), scale, H, width)
        a = a.reshape(B * S, width)
        x = linear(a, blk["proj_w"], blk["proj_b"], residual=x)

        # --- MLP (pre-LN, LN fused into fc GEMM) ---
        h = linear(x, blk["fc_w"], blk["fc_b"],
                   ln=(blk["ln2_g"], blk["ln2_b"]), activation="gelu")
        x = linear(h, blk["out_w"], blk["out_b"], residual=x)

    x = layernorm(x, params["lnf_g"], params["lnf_b"])
    x = x.reshape(B, S, width)

    # EOT pooling: token with highest id (plain-JAX gather), then text projection (no bias)
    eot_idx = jnp.argmax(tokens, axis=-1)
    x_eot = x[jnp.arange(B), eot_idx]                 # (B, width)
    out = linear(x_eot, params["text_proj"])
    return out  # pooling_fn=None -> identity_pooling(out) == out


# ----------------------------------------------------------------------------
# synthetic model parameters (weights stored bf16, LN params / biases f32)
# ----------------------------------------------------------------------------
def make_params(key, vocab, width, heads, layers, ctx, out_dim):
    keys = jax.random.split(key, 3 + layers)
    params = {
        "heads": heads,
        "tok_emb": (jax.random.normal(keys[0], (vocab, width), jnp.float32) * 0.02
                    ).astype(jnp.bfloat16),
        "pos_emb": (jax.random.normal(keys[1], (ctx, width), jnp.float32) * 0.01
                    ).astype(jnp.bfloat16),
        "lnf_g": jnp.ones((width,), jnp.float32),
        "lnf_b": jnp.zeros((width,), jnp.float32),
        "text_proj": (jax.random.normal(keys[2], (width, out_dim), jnp.float32)
                      * width ** -0.5).astype(jnp.bfloat16),
        "blocks": [],
    }
    for layer in range(layers):
        k = jax.random.split(keys[3 + layer], 8)
        params["blocks"].append({
            "ln1_g": 1.0 + 0.05 * jax.random.normal(k[4], (width,), jnp.float32),
            "ln1_b": 0.02 * jax.random.normal(k[5], (width,), jnp.float32),
            "ln2_g": 1.0 + 0.05 * jax.random.normal(k[6], (width,), jnp.float32),
            "ln2_b": 0.02 * jax.random.normal(k[7], (width,), jnp.float32),
            "attn_w": (jax.random.normal(k[0], (width, 3 * width), jnp.float32)
                       * width ** -0.5).astype(jnp.bfloat16),
            "attn_b": 0.02 * jax.random.normal(k[0], (3 * width,), jnp.float32),
            "proj_w": (jax.random.normal(k[1], (width, width), jnp.float32)
                       * width ** -0.5).astype(jnp.bfloat16),
            "proj_b": 0.02 * jax.random.normal(k[1], (width,), jnp.float32),
            "fc_w": (jax.random.normal(k[2], (width, 4 * width), jnp.float32)
                     * width ** -0.5).astype(jnp.bfloat16),
            "fc_b": 0.02 * jax.random.normal(k[2], (4 * width,), jnp.float32),
            "out_w": (jax.random.normal(k[3], (4 * width, width), jnp.float32)
                      * (4 * width) ** -0.5).astype(jnp.bfloat16),
            "out_b": 0.02 * jax.random.normal(k[3], (width,), jnp.float32),
        })
    return params


if __name__ == "__main__":
    # Small but lane-aligned demo shapes: B*S multiple of 128, feature dims multiples of 128.
    B, S, vocab, width, heads, layers, out_dim = 8, 16, 512, 256, 2, 2, 256

    key = jax.random.PRNGKey(0)
    k_tok, k_par = jax.random.split(key)

    tokens = jax.random.randint(k_tok, (B, S), minval=1, maxval=vocab - 1, dtype=jnp.int32)
    eot_pos = (jnp.arange(B) % (S - 1)) + 1                    # deterministic EOT positions
    tokens = tokens.at[jnp.arange(B), eot_pos].set(vocab - 1)  # EOT = highest token id

    params = make_params(k_par, vocab, width, heads, layers, S, out_dim)

    out = encode_text(tokens, params,
                      linear=pallas_linear,
                      layernorm=pallas_layernorm,
                      attention=pallas_attention)
    out = jax.block_until_ready(out)

    ref = encode_text(tokens, params,
                      linear=ref_linear,
                      layernorm=ref_layernorm,
                      attention=ref_attention)

    out_f = out.astype(jnp.float32)
    ref_f = ref.astype(jnp.float32)

    assert out.shape == (B, out_dim)
    assert bool(jnp.all(jnp.isfinite(out_f)))
    assert jnp.allclose(out_f, ref_f, atol=5e-2, rtol=5e-2), \
        float(jnp.max(jnp.abs(out_f - ref_f)))

    print("KERNEL_OK")
</pallas_src>

<mosaic_0001>
module attributes {stable_mosaic.version = 11 : i64} {
  func.func @_linear_kernel(%arg0: i32, %arg1: i32, %arg2: i32, %arg3: memref<128x256xbf16, #tpu.memory_space<vmem>>, %arg4: memref<256x256xbf16, #tpu.memory_space<vmem>>, %arg5: memref<1x256xf32, #tpu.memory_space<vmem>>, %arg6: memref<1x256xf32, #tpu.memory_space<vmem>>, %arg7: memref<1x256xf32, #tpu.memory_space<vmem>>, %arg8: memref<128x256xbf16, #tpu.memory_space<vmem>>, %arg9: memref<128x256xf32, #tpu.memory_space<vmem>>) attributes {dimension_semantics = [#tpu.dimension_semantics<parallel>, #tpu.dimension_semantics<parallel>, #tpu.dimension_semantics<arbitrary>], iteration_bounds = array<i64: 1, 3, 1>, scalar_prefetch = 0 : i64, scratch_operands = 1 : i64, tpu.core_type = #tpu.core_type<tc>, window_params = [{transform_indices = @transform_0, window_bounds = array<i64: 128, 256>}, {transform_indices = @transform_1, window_bounds = array<i64: 256, 256>}, {transform_indices = @transform_2, window_bounds = array<i64: 1, 256>}, {pipeline_mode = #tpu.pipeline_mode<synchronous>, transform_indices = @transform_3, window_bounds = array<i64: 1, 256>}, {pipeline_mode = #tpu.pipeline_mode<synchronous>, transform_indices = @transform_4, window_bounds = array<i64: 1, 256>}, {transform_indices = @transform_5, window_bounds = array<i64: 128, 256>}]} {
    %c0_i32 = arith.constant 0 : i32
    %0 = arith.cmpi eq, %arg2, %c0_i32 : i32
    %1 = arith.extui %0 : i1 to i32
    %c0_i32_0 = arith.constant 0 : i32
    %2 = arith.cmpi ne, %1, %c0_i32_0 : i32
    scf.if %2 {
      %cst_19 = arith.constant 0.000000e+00 : f32
      %36 = vector.broadcast %cst_19 : f32 to vector<128x256xf32>
      %c0_20 = arith.constant 0 : index
      %c0_21 = arith.constant 0 : index
      %37 = vector.load %arg9[%c0_20, %c0_21] : memref<128x256xf32, #tpu.memory_space<vmem>>, vector<128x256xf32>
      tpu.vector_store %arg9[%c0_20, %c0_21], %36 {strides = array<i32>} : memref<128x256xf32, #tpu.memory_space<vmem>>, vector<128x256xf32>,
    } else {
    }
    %c0 = arith.constant 0 : index
    %c0_1 = arith.constant 0 : index
    %3 = vector.load %arg3[%c0, %c0_1] : memref<128x256xbf16, #tpu.memory_space<vmem>>, vector<128x256xbf16>
    %4 = arith.extf %3 : vector<128x256xbf16> to vector<128x256xf32>
    %cst = arith.constant dense<0.000000e+00> : vector<128xf32>
    %5 = vector.multi_reduction <add>, %4, %cst [1] : vector<128x256xf32> to vector<128xf32>
    %6 = vector.shape_cast %5 : vector<128xf32> to vector<128x1xf32>
    %cst_2 = arith.constant 2.560000e+02 : f32
    %7 = vector.broadcast %cst_2 : f32 to vector<128x1xf32>
    %8 = arith.divf %6, %7 : vector<128x1xf32>
    %9 = vector.broadcast %8 : vector<128x1xf32> to vector<128x256xf32>
    %10 = arith.subf %4, %9 : vector<128x256xf32>
    %11 = arith.mulf %10, %10 : vector<128x256xf32>
    %cst_3 = arith.constant dense<0.000000e+00> : vector<128xf32>
    %12 = vector.multi_reduction <add>, %11, %cst_3 [1] : vector<128x256xf32> to vector<128xf32>
    %13 = vector.shape_cast %12 : vector<128xf32> to vector<128x1xf32>
    %cst_4 = arith.constant 2.560000e+02 : f32
    %14 = vector.broadcast %cst_4 : f32 to vector<128x1xf32>
    %15 = arith.divf %13, %14 : vector<128x1xf32>
    %cst_5 = arith.constant 9.99999974E-6 : f32
    %16 = vector.broadcast %cst_5 : f32 to vector<128x1xf32>
    %17 = arith.addf %15, %16 : vector<128x1xf32>
    %18 = math.rsqrt %17 : vector<128x1xf32>
    %19 = vector.broadcast %18 : vector<128x1xf32> to vector<128x256xf32>
    %20 = arith.mulf %10, %19 : vector<128x256xf32>
    %c0_6 = arith.constant 0 : index
    %c0_7 = arith.constant 0 : index
    %21 = vector.load %arg6[%c0_6, %c0_7] : memref<1x256xf32, #tpu.memory_space<vmem>>, vector<1x256xf32>
    %22 = vector.broadcast %21 : vector<1x256xf32> to vector<128x256xf32>
    %23 = arith.mulf %20, %22 : vector<128x256xf32>
    %c0_8 = arith.constant 0 : index
    %c0_9 = arith.constant 0 : index
    %24 = vector.load %arg7[%c0_8, %c0_9] : memref<1x256xf32, #tpu.memory_space<vmem>>, vector<1x256xf32>
    %25 = vector.broadcast %24 : vector<1x256xf32> to vector<128x256xf32>
    %26 = arith.addf %23, %25 : vector<128x256xf32>
    %27 = arith.truncf %26 : vector<128x256xf32> to vector<128x256xbf16>
    %c0_10 = arith.constant 0 : index
    %c0_11 = arith.constant 0 : index
    %28 = vector.load %arg9[%c0_10, %c0_11] : memref<128x256xf32, #tpu.memory_space<vmem>>, vector<128x256xf32>
    %c0_12 = arith.constant 0 : index
    %c0_13 = arith.constant 0 : index
    %29 = vector.load %arg4[%c0_12, %c0_13] : memref<256x256xbf16, #tpu.memory_space<vmem>>, vector<256x256xbf16>
    %cst_14 = arith.constant dense<0.000000e+00> : vector<128x256xf32>
    %30 = tpu.matmul %27, %29, %cst_14 {dimension_numbers = #tpu.dot_dimension_numbers<[1], [0], [0], [1], [0, 0, 1, 1], [], []>} : vector<128x256xbf16>, vector<256x256xbf16>, vector<128x256xf32> -> vector<128x256xf32>
    %31 = arith.addf %28, %30 : vector<128x256xf32>
    %c0_15 = arith.constant 0 : index
    %c0_16 = arith.constant 0 : index
    %32 = vector.load %arg9[%c0_15, %c0_16] : memref<128x256xf32, #tpu.memory_space<vmem>>, vector<128x256xf32>
    tpu.vector_store %arg9[%c0_15, %c0_16], %31 {strides = array<i32>} : memref<128x256xf32, #tpu.memory_space<vmem>>, vector<128x256xf32>,
    %c0_i32_17 = arith.constant 0 : i32
    %33 = arith.cmpi eq, %arg2, %c0_i32_17 : i32
    %34 = arith.extui %33 : i1 to i32
    %c0_i32_18 = arith.constant 0 : i32
    %35 = arith.cmpi ne, %34, %c0_i32_18 : i32
    scf.if %35 {
      %c0_19 = arith.constant 0 : index
      %c0_20 = arith.constant 0 : index
      %36 = vector.load %arg9[%c0_19, %c0_20] : memref<128x256xf32, #tpu.memory_space<vmem>>, vector<128x256xf32>
      %c0_21 = arith.constant 0 : index
      %c0_22 = arith.constant 0 : index
      %37 = vector.load %arg5[%c0_21, %c0_22] : memref<1x256xf32, #tpu.memory_space<vmem>>, vector<1x256xf32>
      %38 = vector.broadcast %37 : vector<1x256xf32> to vector<128x256xf32>
      %39 = arith.addf %36, %38 : vector<128x256xf32>
      %40 = arith.truncf %39 : vector<128x256xf32> to vector<128x256xbf16>
      %c0_23 = arith.constant 0 : index
      %c0_24 = arith.constant 0 : index
      %41 = vector.load %arg8[%c0_23, %c0_24] : memref<128x256xbf16, #tpu.memory_space<vmem>>, vector<128x256xbf16>
      tpu.vector_store %arg8[%c0_23, %c0_24], %40 {strides = array<i32>} : memref<128x256xbf16, #tpu.memory_space<vmem>>, vector<128x256xbf16>,
    } else {
    }
    return
  }
  func.func @transform_0(%arg0: i32, %arg1: i32, %arg2: i32) -> (i32, i32) {
    %c0_i32 = arith.constant 0 : i32
    return %arg0, %arg2 : i32, i32
  }
  func.func @transform_1(%arg0: i32, %arg1: i32, %arg2: i32) -> (i32, i32) {
    %c0_i32 = arith.constant 0 : i32
    return %arg2, %arg1 : i32, i32
  }
  func.func @transform_2(%arg0: i32, %arg1: i32, %arg2: i32) -> (i32, i32) {
    %c0_i32 = arith.constant 0 : i32
    %c0_i32_0 = arith.constant 0 : i32
    return %c0_i32, %arg1 : i32, i32
  }
  func.func @transform_3(%arg0: i32, %arg1: i32, %arg2: i32) -> (i32, i32) {
    %c0_i32 = arith.constant 0 : i32
    %c0_i32_0 = arith.constant 0 : i32
    %c0_i32_1 = arith.constant 0 : i32
    return %c0_i32, %c0_i32_0 : i32, i32
  }
  func.func @transform_4(%arg0: i32, %arg1: i32, %arg2: i32) -> (i32, i32) {
    %c0_i32 = arith.constant 0 : i32
    %c0_i32_0 = arith.constant 0 : i32
    %c0_i32_1 = arith.constant 0 : i32
    return %c0_i32, %c0_i32_0 : i32, i32
  }
  func.func @transform_5(%arg0: i32, %arg1: i32, %arg2: i32) -> (i32, i32) {
    %c0_i32 = arith.constant 0 : i32
    return %arg0, %arg1 : i32, i32
  }
}

</mosaic_0001>

<bundles_post_ra>
// kernel: tpu_custom_call.1
= control target key start
LH: loop header
LB: loop body
LE: loop exit
PB: predicated region body
PF: predicated region fallthrough
CT: control target
= control target key end

     0   :  { %s2755_s0 = inlined_call_operand.hbm [shape: bf16[128,256], index: 0, kind: input, shape index: {}]   ;;  %s2756_s1 = inlined_call_operand.hbm [shape: bf16[256,768], index: 1, kind: input, shape index: {}]   ;;  %s2757_s2 = inlined_call_operand.hbm [shape: f32[1,768], index: 2, kind: input, shape index: {}]   ;;  %s2758_s3 = inlined_call_operand.vmem [shape: f32[1,256], index: 3, kind: input, shape index: {}]   ;;  %s2759_s4 = inlined_call_operand.vmem [shape: f32[1,256], index: 4, kind: input, shape index: {}]   ;;  %s2760_s5 = inlined_call_operand.hbm [shape: bf16[128,768], index: 5, kind: output, shape index: {}]  }
   0x1   :  { %2768 = sst [smem:[#allocation15_spill]] %s2756_s1 }
   0x2   :  { %10 = vsyncpa [#allocation4], 0 }
   0x3   :  { %11 = vsyncpa [#allocation7], 0 }
   0x4   :  { %13 = vsyncpa [#allocation7 + $0x1], 0 }
   0x5   :  { %14 = vsyncpa [#allocation5], 0 }
   0x6   :  { %16 = vsyncpa [#allocation5 + $0x1], 0  ;;  %s2012_s18 = smov 0   ;;  %s2014_s19 = smov 0  }
   0x7   :  { %s2016_s20 = smov 0   ;;  %s2018_s21 = smov 0  }
   0x8   :  { %s2020_s22 = smov 0   ;;  %s2022_s23 = smov 0  }
   0x9 LB: > { %2769 = sst [smem:[#allocation13_spill]] %s1966_s22  ;;  %s37_s24 = sadd.s32 1, %s1966_s22  ;;  %s1970_s23 = sphi %s2022_s23, %s22_s23   ;;  %s1966_s22 = sphi %s2020_s22, %s2787_s22   ;;  %s1962_s21 = sphi %s2018_s21, %s2786_s21   ;;  %s1958_s20 = sphi %s2016_s20, %s2790_s20   ;;  %s1954_s19 = sphi %s2014_s19, %s2789_s19   ;;  %s1950_s18 = sphi %s2012_s18, %s2788_s18  }
   0xa   : > { %s78_s25 = sadd.s32 1, %s1958_s20  ;;  %p39_p0 = scmp.ge.s32.totalorder %s37_s24, 3 }
   0xb   : > { %p85_p1 = scmp.ne.s32.totalorder %s1958_s20, %s1954_s19  ;;  %p86_p2 = scmp.eq.s32.totalorder %s1970_s23, 0 }
   0xc   : > { %s2792_s24 = smov (%p39_p0, %s37_s24), 0  ;;  %p1666_p5 = scmp.lt.s32.totalorder %s1970_s23, 3 }
   0xd   : > { %2770 = sst [smem:[#allocation14_spill]] %s2792_s24  ;;  %p2052_p3 = por %p86_p2, %p85_p1 }
   0xe   : > { %s74_s27 = ssub.s32 %s1966_s22, %s2792_s24  ;;  %s236_s28 = sand.u32 1, %s1970_s23  }
   0xf   : > { %p76_p4 = scmp.eq.s32.totalorder %s74_s27, 0  ;;  %s238_s29 = sand.u32 1, %s1958_s20  }
  0x10   : > { %s1525_s6 = sshll.u32 %s238_s29, 8  ;;  %s1589_s7 = sshll.u32 %s1966_s22, 7 }
  0x11   : > { %s2062_s30 = scalar_select %p76_p4, %s1958_s20, %s78_s25  }
  0x12   : > { %s2772_s1 = sld [smem:[#allocation15_spill]]  ;;  %s240_s11 = scalar_lea.vmem [#allocation6], %s1525_s6 }
  0x13   : > { %s250_s12 = sshll.u32 %s240_s11, 4  ;;  %p2072_p6 = pnand %p1666_p5, %p2052_p3  ;;  %s251_s12 = int_to_ptr.vmem [resolvable:$true] %s250_s12 }
  0x14   : > { %s2076_s14 = scalar_lea.sflag [#allocation7], %s236_s28  ;;  %s1817_s15 = scalar_lea.vmem %s251_s12, 4096 }
  0x15   : > { %p1806_p7 = pneg %p2072_p6  ;;  %p1818_p8 = scmp.ne.s32.totalorder %s251_s12, %s1817_s15 }
  0x16   : > { %s1972_s16 = smov [#allocation6]  }
  0x17   : > { %p1820_p9 = pnand %p1818_p8, %p1806_p7  ;;  %s1822_s17 = sshll.u32 %s1972_s16, 4  ;;  %s1823_s17 = int_to_ptr.vmem [resolvable:$false] %s1822_s17 }
  0x18   : > { %s249_s10 = scalar_lea.hbm %s2772_s1, %s1589_s7  ;;  %s1824_s25 = scalar_lea.vmem %s1823_s17, 8192 }
  0x19   : > { %p1821_p10 = pneg %p1820_p9  ;;  %p1825_p11 = scmp.lt.s32.totalorder %s251_s12, %s1823_s17 }
  0x1a   : > { %p1826_p12 = scmp.lt.s32.totalorder %s1824_s25, %s1817_s15 }
  0x1c   : > { %p1827_p13 = por %p1826_p12, %p1825_p11 }
  0x1e   : > { %p1828_p0 = pnand %p1827_p13, %p1821_p10 }
  0x20   : > { %1831 = shalt.err (!%p1828_p0)
}
  0x21   : > { %s1973_s26 = smov 384   ;;  %s2761_s27 = smov 128  }
  0x22   : > { %s2762_s28 = smov 8   ;;  %s2089_s6 = sadd.s32 4294967295, %s1970_s23  }
  0x23   : > { %1657 = dma.hbm_to_vmem [thread:$0]  (!%p2072_p6), %s249_s10, 4096, %s251_s12, %s2076_s14, %s1973_s26, %s2761_s27, %s2762_s28  }
  0x24   : > { %s1521_s7 = sadd.s32 4294967294, %s1970_s23   ;;  %p91_p2 = scmp.ne.s32.totalorder %s1954_s19, %s1950_s18 }
  0x25   : > { %p2766_p3 = scmp.eq.s32.totalorder %s2089_s6, 0  ;;  %p185_p4 = scmp.eq.s32.totalorder %s2089_s6, 2 }
  0x26   : > { %p191_p5 = scmp.eq.s32.totalorder %s1521_s7, 2  ;;  %p1522_p9 = scmp.ge.s32.totalorder %s1970_s23, 1 }
  0x27   : > { %p2098_p8 = por %p2766_p3, %p91_p2  ;;  %p2106_p10 = por %p185_p4, %p85_p1 }
  0x28   : > { %p2110_p11 = por %p191_p5, %p91_p2  ;;  %p198_p12 = scmp.lt.s32.totalorder %s1970_s23, 4 }
  0x29   : > { %s2774_s8 = scalar_select %p2098_p8, 1, 0 }
  0x2a   : > { %s2775_s9 = scalar_select %p2106_p10, 1, 0 }
  0x2b   : > { %s2776_s10 = scalar_select %p2110_p11, 1, 0 }
  0x2c   : > { %s1528_s11 = sshll.u32 %s238_s29, 1  ;;  %p2117_p13 = pnand %p1522_p9, %p198_p12 }
  0x2d   : > { %s1976_s15 = smov [#allocation3]   ;;  %s1590_s17 = sshll.u32 %s1966_s22, 5 }
  0x2e   : > { %s216_s16 = sshll.u32 %s1976_s15, 4  ;;  %p1650_p1 = pneg %p2117_p13  ;;  %s2121_s16 = int_to_ptr.vmem [resolvable:$true] %s216_s16 }
  0x2f   : > { %s270_s7 = scalar_lea.hbm %s2757_s2, %s1590_s17  ;;  %s264_s27 = scalar_lea.vmem [#allocation8], %s1528_s11 }
  0x30   : > { %s272_s28 = sshll.u32 %s264_s27, 4  ;;  %p2131_p0 = pnand %p1650_p1, %p2766_p3  ;;  %s273_s28 = int_to_ptr.vmem [resolvable:$true] %s272_s28 }
  0x31   : > { %s1845_s1 = scalar_lea.vmem %s273_s28, 32  ;;  %s1977_s15 = smov [#allocation8]  }
  0x32   : > { %p1846_p2 = scmp.ne.s32.totalorder %s273_s28, %s1845_s1  ;;  %s1850_s24 = sshll.u32 %s1977_s15, 4  ;;  %s1851_s24 = int_to_ptr.vmem [resolvable:$false] %s1850_s24 }
  0x33   : > { %s1852_s22 = scalar_lea.vmem %s1851_s24, 64  ;;  %p1853_p9 = scmp.lt.s32.totalorder %s273_s28, %s1851_s24 }
  0x34   : > { %p1848_p4 = pnand %p1846_p2, %p1806_p7  ;;  %p1854_p12 = scmp.lt.s32.totalorder %s1852_s22, %s1845_s1 }
  0x36   : > { %p1849_p5 = pneg %p1848_p4  ;;  %p1855_p11 = por %p1854_p12, %p1853_p9 }
  0x38   : > { %p1856_p10 = pnand %p1855_p11, %p1849_p5 }
  0x3a   : > { %1859 = shalt.err (!%p1856_p10)
}
  0x3b   : > { %1660 = dma.hbm_to_vmem [thread:$0]  (!%p2072_p6), %s270_s7, 32, %s273_s28, %s2076_s14  }
  0x3c   : > { %p1862_p7 = pneg %p2131_p0  ;;  %s1871_s27 = scalar_lea.vmem %s2121_s16, 2048 }
  0x3d   : > { %p1872_p1 = scmp.ne.s32.totalorder %s2121_s16, %s1871_s27  ;;  %p1879_p3 = scmp.lt.s32.totalorder %s2121_s16, %s2121_s16 }
  0x3e   : > { %p1880_p8 = scmp.lt.s32.totalorder %s1871_s27, %s1871_s27 }
  0x3f   : > { %p1874_p2 = pnand %p1872_p1, %p1862_p7 }
  0x40   : > { %p1881_p9 = por %p1880_p8, %p1879_p3 }
  0x41   : > { %p1875_p4 = pneg %p1874_p2 }
  0x43   : > { %p1882_p11 = pnand %p1881_p9, %p1875_p4 }
  0x45   : > { %1885 = shalt.err (!%p1882_p11)
}
  0x46   : > { %s2779_s1 = smov 8   ;;  %s2780_s22 = smov 128  }
  0x47   : > { %1653 = dma.hbm_to_vmem [thread:$0]  (!%p2131_p0), %s2755_s0, 2048, %s2121_s16, [#allocation4], %s2780_s22, %s2780_s22, %s2779_s1  }
  0x48   : > { %281 = sbr.rel (%p2117_p13) target bundleno = 650 (0x28a), region = 40  ;;  %p2781_p6 = scmp.eq.s32.totalorder (!%p2117_p13), %s2089_s6, 0 }
  0x4d   : > { %1937 = dma.done.wait (%p2781_p6), [#allocation4], 2048   ;;  %p2782_p3 = pmov %p2781_p6 }
  0x4e   : > { %s287_s14 = sand.u32 1, %s2089_s6   ;;  %s2164_s28 = sand.u32 1, %s1954_s19  }
  0x4f   : > { %1939 = vsyncadd (%p2782_p3), [#allocation4], 4294965248  ;;  %s1533_s11 = sshll.u32 %s2164_s28, 8  ;;  %s288_s17 = scalar_lea.sflag [#allocation7], %s287_s14 }
  0x50   : > { %s2167_s25 = scalar_lea.vmem [#allocation6], %s1533_s11  ;;  %p2783_p8 = scmp.ne.s32.totalorder %s2774_s8, 0 }
  0x52   : > { %1941 = dma.done.wait (%p2783_p8), %s288_s17, 4128  }
  0x53   : > { %1943 = vsyncadd (%p2783_p8), %s288_s17, 4294963168  ;;  %v2173_v0 = vld [vmem:[#allocation3] sm:$0xff]  ;;  %v2177_v2 = vld [vmem:[#allocation3 + $0x8] sm:$0xff]  ;;  %s1534_s26 = sshll.u32 %s2164_s28, 1  ;;  %s1535_s29 = sshll.u32 %s2164_s28, 7 }
  0x54   : > { %v2175_v1 = vld [vmem:[#allocation3 + $0x40] sm:$0xff]  ;;  %v391_v3 = vunpack.c.l.bf16 %v2173_v0  ;;  %v392_v4 = vunpack.c.h.bf16 %v2173_v0  ;;  %v2183_v7 = vld [vmem:[#allocation3 + $0x48] sm:$0xff]  ;;  %v2185_v8 = vld [vmem:[#allocation3 + $0x10] sm:$0xff]  ;;  %v393_v9 = vunpack.c.l.bf16 %v2177_v2  ;;  %v394_v10 = vunpack.c.h.bf16 %v2177_v2  ;;  %s300_s7 = scalar_lea.vmem [#allocation8], %s1534_s26  ;;  %s2653_s15 = scalar_lea.vmem [#allocation9], %s1535_s29 }
  0x55   : > { %v407_v5 = vunpack.c.l.bf16 %v2175_v1  ;;  %v408_v6 = vunpack.c.h.bf16 %v2175_v1  ;;  %v409_v11 = vunpack.c.l.bf16 %v2183_v7  ;;  %v410_v12 = vunpack.c.h.bf16 %v2183_v7  ;;  %v2191_v13 = vld [vmem:[#allocation3 + $0x18] sm:$0xff]  ;;  %v2203_v18 = vld [vmem:[#allocation3 + $0x50] sm:$0xff]  ;;  %v2217_v24 = vld [vmem:[#allocation3 + $0x20] sm:$0xff]  ;;  %s1607_s27 = sshll.u32 %s1962_s21, 7  ;;  %s1393_s1 = sshll.u32 %s2653_s15, 4  ;;  %s2707_s1 = int_to_ptr.vmem [resolvable:$true] %s1393_s1 }
  0x56   : > { %v423_v14 = vadd.f32 %v392_v4, %v391_v3  ;;  %v395_v16 = vunpack.c.l.bf16 %v2185_v8  ;;  %v396_v17 = vunpack.c.h.bf16 %v2185_v8  ;;  %v426_v19 = vadd.f32 %v394_v10, %v393_v9  ;;  %v2215_v23 = vld [vmem:[#allocation3 + $0x58] sm:$0xff]  ;;  %v2224_v27 = vld [vmem:[#allocation3 + $0x28] sm:$0xff]  ;;  %v2233_v32 = vld [vmem:[#allocation3 + $0x60] sm:$0xff]  ;;  %s2705_s13 = scalar_lea.hbm %s2760_s5, %s1607_s27  ;;  %s1377_s21 = scalar_lea.sflag [#allocation5], %s2164_s28 }
  0x57   : > { %v447_v15 = vadd.f32 %v408_v6, %v407_v5  ;;  %v450_v20 = vadd.f32 %v410_v12, %v409_v11  ;;  %v397_v21 = vunpack.c.l.bf16 %v2191_v13  ;;  %v398_v22 = vunpack.c.h.bf16 %v2191_v13  ;;  %v2237_v35 = vld [vmem:[#allocation3 + $0x68] sm:$0xff]  ;;  %v2261_v46 = vld [vmem:[#allocation3 + $0x30] sm:$0xff]  ;;  %v2263_v47 = vld [vmem:[#allocation3 + $0x38] sm:$0xff]  ;;  %s1886_s14 = scalar_lea.vmem %s2707_s1, 2048  ;;  %p2784_p13 = scmp.ne.s32.totalorder %s2775_s9, 0 }
  0x58   : > { %424 = vadd.xlane.f32.xlu0 %v423_v14  ;;  %v429_v25 = vadd.f32 %v396_v17, %v395_v16  ;;  %v411_v26 = vunpack.c.l.bf16 %v2203_v18  ;;  %v412_v29 = vunpack.c.h.bf16 %v2203_v18  ;;  %v413_v30 = vunpack.c.l.bf16 %v2215_v23  ;;  %v2277_v54 = vld [vmem:[#allocation3 + $0x70] sm:$0xff]  ;;  %v2279_v55 = vld [vmem:[#allocation3 + $0x78] sm:$0xff]  ;;  %p1887_p10 = scmp.ne.s32.totalorder %s2707_s1, %s1886_s14  ;;  %s1978_s11 = smov [#allocation9]  }
  0x59   : > { %448 = vadd.xlane.f32.xlu1 %v447_v15  ;;  %v432_v28 = vadd.f32 %v398_v22, %v397_v21  ;;  %v414_v31 = vunpack.c.h.bf16 %v2215_v23  ;;  %v399_v33 = vunpack.c.l.bf16 %v2217_v24  ;;  %v400_v34 = vunpack.c.h.bf16 %v2217_v24  ;;  %v1724_v14 = vld [vmem:[%s2167_s25 + $0x74] ss:$8 sps:$4 sm:$0xff]   ;;  %v1726_v15 = vld [vmem:[%s2167_s25 + $0x70] ss:$8 sps:$4 sm:$0xff]   ;;  %s1890_s17 = sshll.u32 %s1978_s11, 4  ;;  %s1891_s17 = int_to_ptr.vmem [resolvable:$false] %s1890_s17 }
  0x5a   : > { %v453_v36 = vadd.f32 %v412_v29, %v411_v26  ;;  %v401_v38 = vunpack.c.l.bf16 %v2224_v27  ;;  %v402_v39 = vunpack.c.h.bf16 %v2224_v27  ;;  %v415_v41 = vunpack.c.l.bf16 %v2233_v32  ;;  %1008 = vmatprep.subr.bf16.mxu0 %v1724_v14  ;;  %1608 = vmatprep.subr.bf16.mxu1 %v1724_v14  ;;  %v1748_v14 = vld [vmem:[%s2167_s25 + $0xf4] ss:$8 sps:$4 sm:$0xff]   ;;  %p1888_p0 = pnand %p1887_p10, %p2784_p13  ;;  %p1893_p12 = scmp.lt.s32.totalorder %s2707_s1, %s1891_s17 }
  0x5b   : > { %v456_v37 = vadd.f32 %v414_v31, %v413_v30  ;;  %v435_v40 = vadd.f32 %v400_v34, %v399_v33  ;;  %v416_v43 = vunpack.c.h.bf16 %v2233_v32  ;;  %v417_v44 = vunpack.c.l.bf16 %v2237_v35  ;;  %1009 = vmatpush1.bf16.msra.mxu0 %v1726_v15  ;;  %1624 = vmatpush1.bf16.msra.mxu1 %v1726_v15 }
  0x5c   : > { %427 = vadd.xlane.f32.xlu0 %v426_v19  ;;  %v438_v42 = vadd.f32 %v402_v39, %v401_v38  ;;  %v418_v45 = vunpack.c.h.bf16 %v2237_v35  ;;  %v403_v48 = vunpack.c.l.bf16 %v2261_v46  ;;  %v404_v49 = vunpack.c.h.bf16 %v2261_v46  ;;  %v1727_v19 = vld [vmem:[%s2167_s25 + $0x64] ss:$8 sps:$4 sm:$0xff]   ;;  %p1889_p5 = pneg %p1888_p0 }
  0x5d   : > { %451 = vadd.xlane.f32.xlu1 %v450_v20  ;;  %v459_v50 = vadd.f32 %v416_v43, %v415_v41  ;;  %v405_v52 = vunpack.c.l.bf16 %v2263_v47  ;;  %v406_v53 = vunpack.c.h.bf16 %v2263_v47  ;;  %v419_v57 = vunpack.c.l.bf16 %v2277_v54  ;;  %v1729_v20 = vld [vmem:[%s2167_s25 + $0x60] ss:$8 sps:$4 sm:$0xff]   ;;  %1010 = vmatprep.subr.bf16.mxu0 %v1727_v19 }
  0x5e   : > { %v462_v51 = vadd.f32 %v418_v45, %v417_v44  ;;  %v441_v56 = vadd.f32 %v404_v49, %v403_v48  ;;  %v420_v59 = vunpack.c.h.bf16 %v2277_v54  ;;  %v421_v60 = vunpack.c.l.bf16 %v2279_v55  ;;  %1609 = vmatprep.subr.bf16.mxu1 %v1727_v19 }
  0x5f   : > { %v444_v58 = vadd.f32 %v406_v53, %v405_v52  ;;  %v422_v61 = vunpack.c.h.bf16 %v2279_v55  ;;  %1011 = vmatpush1.bf16.msra.mxu0 %v1729_v20  ;;  %1625 = vmatpush1.bf16.msra.mxu1 %v1729_v20 }
  0x60   : > { %430 = vadd.xlane.f32.xlu0 %v429_v25  ;;  %v465_v62 = vadd.f32 %v420_v59, %v419_v57  ;;  %v1730_v25 = vld [vmem:[%s2167_s25 + $0x54] ss:$8 sps:$4 sm:$0xff]  }
  0x61   : > { %433 = vadd.xlane.f32.xlu1 %v432_v28  ;;  %v468_v63 = vadd.f32 %v422_v61, %v421_v60  ;;  %v1732_v28 = vld [vmem:[%s2167_s25 + $0x50] ss:$8 sps:$4 sm:$0xff]   ;;  %1012 = vmatprep.subr.bf16.mxu0 %v1730_v25 }
  0x62   : > { %1610 = vmatprep.subr.bf16.mxu1 %v1730_v25 }
  0x63   : > { %1013 = vmatpush1.bf16.msra.mxu0 %v1732_v28  ;;  %1626 = vmatpush1.bf16.msra.mxu1 %v1732_v28 }
  0x64   : > { %454 = vadd.xlane.f32.xlu0 %v453_v36  ;;  %v1733_v36 = vld [vmem:[%s2167_s25 + $0x44] ss:$8 sps:$4 sm:$0xff]  }
  0x65   : > { %457 = vadd.xlane.f32.xlu1 %v456_v37  ;;  %v1735_v37 = vld [vmem:[%s2167_s25 + $0x40] ss:$8 sps:$4 sm:$0xff]   ;;  %1014 = vmatprep.subr.bf16.mxu0 %v1733_v36 }
  0x66   : > { %1611 = vmatprep.subr.bf16.mxu1 %v1733_v36 }
  0x67   : > { %1015 = vmatpush1.bf16.msra.mxu0 %v1735_v37  ;;  %1627 = vmatpush1.bf16.msra.mxu1 %v1735_v37 }
  0x68   : > { %436 = vadd.xlane.f32.xlu0 %v435_v40  ;;  %v1736_v40 = vld [vmem:[%s2167_s25 + $0x34] ss:$8 sps:$4 sm:$0xff]  }
  0x69   : > { %439 = vadd.xlane.f32.xlu1 %v438_v42  ;;  %v1738_v42 = vld [vmem:[%s2167_s25 + $0x30] ss:$8 sps:$4 sm:$0xff]   ;;  %1016 = vmatprep.subr.bf16.mxu0 %v1736_v40 }
  0x6a   : > { %1612 = vmatprep.subr.bf16.mxu1 %v1736_v40 }
  0x6b   : > { %1017 = vmatpush1.bf16.msra.mxu0 %v1738_v42  ;;  %1628 = vmatpush1.bf16.msra.mxu1 %v1738_v42 }
  0x6c   : > { %460 = vadd.xlane.f32.xlu0 %v459_v50  ;;  %v1739_v50 = vld [vmem:[%s2167_s25 + $0x24] ss:$8 sps:$4 sm:$0xff]  }
  0x6d   : > { %463 = vadd.xlane.f32.xlu1 %v462_v51  ;;  %v1741_v51 = vld [vmem:[%s2167_s25 + $0x20] ss:$8 sps:$4 sm:$0xff]   ;;  %1018 = vmatprep.subr.bf16.mxu0 %v1739_v50 }
  0x6e   : > { %1613 = vmatprep.subr.bf16.mxu1 %v1739_v50 }
  0x6f   : > { %1019 = vmatpush1.bf16.msra.mxu0 %v1741_v51  ;;  %1629 = vmatpush1.bf16.msra.mxu1 %v1741_v51 }
  0x70   : > { %442 = vadd.xlane.f32.xlu0 %v441_v56  ;;  %v1742_v56 = vld [vmem:[%s2167_s25 + $0x14] ss:$8 sps:$4 sm:$0xff]  }
  0x71   : > { %445 = vadd.xlane.f32.xlu1 %v444_v58  ;;  %v1744_v58 = vld [vmem:[%s2167_s25 + $0x10] ss:$8 sps:$4 sm:$0xff]   ;;  %1020 = vmatprep.subr.bf16.mxu0 %v1742_v56 }
  0x72   : > { %1614 = vmatprep.subr.bf16.mxu1 %v1742_v56 }
  0x73   : > { %1021 = vmatpush1.bf16.msra.mxu0 %v1744_v58  ;;  %1630 = vmatpush1.bf16.msra.mxu1 %v1744_v58 }
  0x74   : > { %466 = vadd.xlane.f32.xlu0 %v465_v62  ;;  %v1745_v62 = vld [vmem:[%s2167_s25 + $0x4] ss:$8 sps:$4 sm:$0xff]  }
  0x75   : > { %469 = vadd.xlane.f32.xlu1 %v468_v63  ;;  %v1747_v63 = vld [vmem:[%s2167_s25] ss:$8 sps:$4 sm:$0xff]   ;;  %1022 = vmatprep.subr.bf16.mxu0 %v1745_v62 }
  0x76   : > { %1615 = vmatprep.subr.bf16.mxu1 %v1745_v62 }
  0x77   : > { %1023 = vmatpush1.bf16.msra.mxu0 %v1747_v63  ;;  %1631 = vmatpush1.bf16.msra.mxu1 %v1747_v63 }
  0x78   : > { %1024 = vmatprep.subr.bf16.mxu0 %v1748_v14  ;;  %1616 = vmatprep.subr.bf16.mxu1 %v1748_v14 }
  0xe1   : > { %v425_v15 = vpop.xlane.xlu0 %424 }
  0xe2   : > { %v449_v19 = vpop.xlane.xlu1 %448  ;;  %v472_v20 = vmul.f32 0.00390625, %v425_v15 }
  0xe3   : > { %v480_v25 = vmul.f32 0.00390625, %v449_v19 }
  0xe4   : > { %v2320_v28 = vsub.f32 %v391_v3, %v472_v20  ;;  %v2324_v36 = vsub.f32 %v392_v4, %v472_v20 }
  0xe5   : > { %v2328_v37 = vsub.f32 %v407_v5, %v480_v25  ;;  %v2332_v40 = vsub.f32 %v408_v6, %v480_v25  ;;  %v428_v42 = vpop.xlane.xlu0 %427 }
  0xe6   : > { %v452_v50 = vpop.xlane.xlu1 %451  ;;  %v473_v51 = vmul.f32 0.00390625, %v428_v42  ;;  %v520_v3 = vmul.f32 %v2320_v28, %v2320_v28  ;;  %v521_v0 = vmul.f32 %v2324_v36, %v2324_v36 }
  0xe7   : > { %v481_v56 = vmul.f32 0.00390625, %v452_v50  ;;  %v536_v4 = vmul.f32 %v2328_v37, %v2328_v37  ;;  %v537_v5 = vmul.f32 %v2332_v40, %v2332_v40 }
  0xe8   : > { %v2344_v1 = vsub.f32 %v393_v9, %v473_v51  ;;  %v2348_v6 = vsub.f32 %v394_v10, %v473_v51  ;;  %v552_v14 = vadd.f32 %v521_v0, %v520_v3 }
  0xe9   : > { %v2352_v58 = vsub.f32 %v409_v11, %v481_v56  ;;  %v2356_v62 = vsub.f32 %v410_v12, %v481_v56  ;;  %v431_v63 = vpop.xlane.xlu0 %430  ;;  %v576_v10 = vadd.f32 %v537_v5, %v536_v4 }
  0xea   : > { %v434_v15 = vpop.xlane.xlu1 %433  ;;  %v474_v19 = vmul.f32 0.00390625, %v431_v63  ;;  %v522_v9 = vmul.f32 %v2344_v1, %v2344_v1  ;;  %v523_v2 = vmul.f32 %v2348_v6, %v2348_v6  ;;  %553 = vadd.xlane.f32.xlu0 %v552_v14 }
  0xeb   : > { %v475_v20 = vmul.f32 0.00390625, %v434_v15  ;;  %v538_v11 = vmul.f32 %v2352_v58, %v2352_v58  ;;  %v539_v7 = vmul.f32 %v2356_v62, %v2356_v62 }
  0xec   : > { %v2368_v12 = vsub.f32 %v395_v16, %v474_v19  ;;  %v2372_v25 = vsub.f32 %v396_v17, %v474_v19  ;;  %v555_v56 = vadd.f32 %v523_v2, %v522_v9 }
  0xed   : > { %v2376_v42 = vsub.f32 %v397_v21, %v475_v20  ;;  %v2380_v50 = vsub.f32 %v398_v22, %v475_v20  ;;  %v455_v51 = vpop.xlane.xlu0 %454  ;;  %v579_v17 = vadd.f32 %v539_v7, %v538_v11 }
  0xee   : > { %v458_v3 = vpop.xlane.xlu1 %457  ;;  %v482_v0 = vmul.f32 0.00390625, %v455_v51  ;;  %v524_v16 = vmul.f32 %v2368_v12, %v2368_v12  ;;  %v525_v8 = vmul.f32 %v2372_v25, %v2372_v25  ;;  %577 = vadd.xlane.f32.xlu0 %v576_v10  ;;  %556 = vadd.xlane.f32.xlu1 %v555_v56 }
  0xef   : > { %v483_v4 = vmul.f32 0.00390625, %v458_v3  ;;  %v526_v21 = vmul.f32 %v2376_v42, %v2376_v42  ;;  %v527_v13 = vmul.f32 %v2380_v50, %v2380_v50 }
  0xf0   : > { %v2392_v22 = vsub.f32 %v411_v26, %v482_v0  ;;  %v2396_v5 = vsub.f32 %v412_v29, %v482_v0  ;;  %v558_v19 = vadd.f32 %v525_v8, %v524_v16 }
  0xf1   : > { %v2400_v63 = vsub.f32 %v413_v30, %v483_v4  ;;  %v2404_v14 = vsub.f32 %v414_v31, %v483_v4  ;;  %v437_v15 = vpop.xlane.xlu0 %436  ;;  %v561_v29 = vadd.f32 %v527_v13, %v526_v21  ;;  %v1750_v31 = vld [vmem:[%s2167_s25 + $0xf0] ss:$8 sps:$4 sm:$0xff]  }
  0xf2   : > { %v440_v20 = vpop.xlane.xlu1 %439  ;;  %v476_v9 = vmul.f32 0.00390625, %v437_v15  ;;  %v540_v26 = vmul.f32 %v2392_v22, %v2392_v22  ;;  %v541_v18 = vmul.f32 %v2396_v5, %v2396_v5  ;;  %580 = vadd.xlane.f32.xlu1 %v579_v17  ;;  %559 = vadd.xlane.f32.xlu0 %v558_v19  ;;  %v1753_v15 = vld [vmem:[%s2167_s25 + $0xe0] ss:$8 sps:$4 sm:$0xff]  }
  0xf3   : > { %v477_v2 = vmul.f32 0.00390625, %v440_v20  ;;  %v542_v30 = vmul.f32 %v2400_v63, %v2400_v63  ;;  %v543_v23 = vmul.f32 %v2404_v14, %v2404_v14  ;;  %1025 = vmatpush2.bf16.msra.mxu0 %v1750_v31  ;;  %1632 = vmatpush2.bf16.msra.mxu1 %v1750_v31  ;;  %v1756_v31 = vld [vmem:[%s2167_s25 + $0xd0] ss:$8 sps:$4 sm:$0xff]  }
  0xf4   : > { %v2417_v10 = vsub.f32 %v399_v33, %v476_v9  ;;  %v2421_v11 = vsub.f32 %v400_v34, %v476_v9  ;;  %v582_v3 = vadd.f32 %v541_v18, %v540_v26  ;;  %v1754_v26 = vld [vmem:[%s2167_s25 + $0xd4] ss:$8 sps:$4 sm:$0xff]  }
  0xf5   : > { %v2425_v7 = vsub.f32 %v401_v38, %v477_v2  ;;  %v2429_v51 = vsub.f32 %v402_v39, %v477_v2  ;;  %v461_v56 = vpop.xlane.xlu0 %460  ;;  %v1751_v38 = vld [vmem:[%s2167_s25 + $0xe4] ss:$8 sps:$4 sm:$0xff]   ;;  %v585_v27 = vadd.f32 %v543_v23, %v542_v30 }
  0xf6   : > { %v464_v0 = vpop.xlane.xlu1 %463  ;;  %v484_v33 = vmul.f32 0.00390625, %v461_v56  ;;  %v528_v24 = vmul.f32 %v2417_v10, %v2417_v10  ;;  %v529_v34 = vmul.f32 %v2421_v11, %v2421_v11  ;;  %562 = vadd.xlane.f32.xlu1 %v561_v29  ;;  %583 = vadd.xlane.f32.xlu0 %v582_v3 }
  0xf7   : > { %v485_v4 = vmul.f32 0.00390625, %v464_v0  ;;  %v530_v39 = vmul.f32 %v2425_v7, %v2425_v7  ;;  %v531_v16 = vmul.f32 %v2429_v51, %v2429_v51  ;;  %1026 = vmatprep.subr.bf16.mxu0 %v1751_v38  ;;  %1617 = vmatprep.subr.bf16.mxu1 %v1751_v38 }
  0xf8   : > { %v2442_v8 = vsub.f32 %v415_v41, %v484_v33  ;;  %v2446_v17 = vsub.f32 %v416_v43, %v484_v33  ;;  %v564_v20 = vadd.f32 %v529_v34, %v528_v24  ;;  %1027 = vmatpush2.bf16.msra.mxu0 %v1753_v15  ;;  %1633 = vmatpush2.bf16.msra.mxu1 %v1753_v15 }
  0xf9   : > { %v2450_v21 = vsub.f32 %v417_v44, %v485_v4  ;;  %v2454_v13 = vsub.f32 %v418_v45, %v485_v4  ;;  %v443_v19 = vpop.xlane.xlu0 %442  ;;  %v567_v35 = vadd.f32 %v531_v16, %v530_v39  ;;  %1028 = vmatprep.subr.bf16.mxu0 %v1754_v26  ;;  %1618 = vmatprep.subr.bf16.mxu1 %v1754_v26  ;;  %v1757_v4 = vld [vmem:[%s2167_s25 + $0xc4] ss:$8 sps:$4 sm:$0xff]   ;;  %v1759_v39 = vld [vmem:[%s2167_s25 + $0xc0] ss:$8 sps:$4 sm:$0xff]  }
  0xfa   : > { %v446_v9 = vpop.xlane.xlu1 %445  ;;  %v478_v41 = vmul.f32 0.00390625, %v443_v19  ;;  %v544_v43 = vmul.f32 %v2442_v8, %v2442_v8  ;;  %v545_v44 = vmul.f32 %v2446_v17, %v2446_v17  ;;  %586 = vadd.xlane.f32.xlu1 %v585_v27  ;;  %565 = vadd.xlane.f32.xlu0 %v564_v20  ;;  %v1762_v19 = vld [vmem:[%s2167_s25 + $0xb0] ss:$8 sps:$4 sm:$0xff]  }
  0xfb   : > { %v479_v32 = vmul.f32 0.00390625, %v446_v9  ;;  %v546_v45 = vmul.f32 %v2450_v21, %v2450_v21  ;;  %v547_v2 = vmul.f32 %v2454_v13, %v2454_v13  ;;  %v1763_v9 = vld [vmem:[%s2167_s25 + $0xa4] ss:$8 sps:$4 sm:$0xff]  }
  0xfc   : > { %v2468_v18 = vsub.f32 %v403_v48, %v478_v41  ;;  %v2472_v29 = vsub.f32 %v404_v49, %v478_v41  ;;  %v588_v3 = vadd.f32 %v545_v44, %v544_v43  ;;  %1029 = vmatpush2.bf16.msra.mxu0 %v1756_v31  ;;  %1634 = vmatpush2.bf16.msra.mxu1 %v1756_v31  ;;  %v1765_v41 = vld [vmem:[%s2167_s25 + $0xa0] ss:$8 sps:$4 sm:$0xff]   ;;  %v1768_v43 = vld [vmem:[%s2167_s25 + $0x90] ss:$8 sps:$4 sm:$0xff]   ;;  %v1769_v44 = vld [vmem:[%s2167_s25 + $0x84] ss:$8 sps:$4 sm:$0xff]  }
  0xfd   : > { %v2476_v30 = vsub.f32 %v405_v52, %v479_v32  ;;  %v2480_v23 = vsub.f32 %v406_v53, %v479_v32  ;;  %v467_v56 = vpop.xlane.xlu0 %466  ;;  %v591_v47 = vadd.f32 %v547_v2, %v546_v45  ;;  %1030 = vmatprep.subr.bf16.mxu0 %v1757_v4  ;;  %1619 = vmatprep.subr.bf16.mxu1 %v1757_v4  ;;  %v1766_v32 = vld [vmem:[%s2167_s25 + $0x94] ss:$8 sps:$4 sm:$0xff]  }
  0xfe   : > { %v470_v0 = vpop.xlane.xlu1 %469  ;;  %v486_v48 = vmul.f32 0.00390625, %v467_v56  ;;  %v532_v49 = vmul.f32 %v2468_v18, %v2468_v18  ;;  %v533_v52 = vmul.f32 %v2472_v29, %v2472_v29  ;;  %568 = vadd.xlane.f32.xlu1 %v567_v35  ;;  %589 = vadd.xlane.f32.xlu0 %v588_v3  ;;  %v1771_v35 = vld [vmem:[%s2167_s25 + $0x80] ss:$8 sps:$4 sm:$0xff]  }
  0xff   : > { %v487_v46 = vmul.f32 0.00390625, %v470_v0  ;;  %v534_v53 = vmul.f32 %v2476_v30, %v2476_v30  ;;  %v535_v33 = vmul.f32 %v2480_v23, %v2480_v23 }
 0x100   : > { %v2494_v24 = vsub.f32 %v419_v57, %v486_v48  ;;  %v2498_v34 = vsub.f32 %v420_v59, %v486_v48  ;;  %v570_v16 = vadd.f32 %v533_v52, %v532_v49  ;;  %1031 = vmatpush2.bf16.msra.mxu0 %v1759_v39  ;;  %1635 = vmatpush2.bf16.msra.mxu1 %v1759_v39  ;;  %v682_v48 = vlaneseq }
 0x101   : > { %v2502_v38 = vsub.f32 %v421_v60, %v487_v46  ;;  %v2506_v27 = vsub.f32 %v422_v61, %v487_v46  ;;  %v573_v59 = vadd.f32 %v535_v33, %v534_v53  ;;  %v1760_v61 = vld [vmem:[%s2167_s25 + $0xb4] ss:$8 sps:$4 sm:$0xff]   ;;  %s1892_s25 = scalar_lea.vmem %s1891_s17, 4096 }
 0x102   : > { %v548_v57 = vmul.f32 %v2494_v24, %v2494_v24  ;;  %v549_v54 = vmul.f32 %v2498_v34, %v2498_v34  ;;  %592 = vadd.xlane.f32.xlu1 %v591_v47  ;;  %571 = vadd.xlane.f32.xlu0 %v570_v16  ;;  %v683_v4 = vshrl.u32 %v682_v48, 7  ;;  %p1894_p7 = scmp.lt.s32.totalorder %s1892_s25, %s1886_s14 }
 0x103   : > { %v550_v55 = vmul.f32 %v2502_v38, %v2502_v38  ;;  %v551_v60 = vmul.f32 %v2506_v27, %v2506_v27  ;;  %1032 = vmatprep.subr.bf16.mxu0 %v1760_v61  ;;  %1620 = vmatprep.subr.bf16.mxu1 %v1760_v61  ;;  %v680_v61 = vld [vmem:[%s2758_s3] sm:$0x3] }
 0x104   : > { %v594_v15 = vadd.f32 %v549_v54, %v548_v57  ;;  %1033 = vmatpush2.bf16.msra.mxu0 %v1762_v19  ;;  %1636 = vmatpush2.bf16.msra.mxu1 %v1762_v19  ;;  %p1895_p1 = por %p1894_p7, %p1893_p12 }
 0x105   : > { %v597_v20 = vadd.f32 %v551_v60, %v550_v55  ;;  %1034 = vmatprep.subr.bf16.mxu0 %v1763_v9  ;;  %1621 = vmatprep.subr.bf16.mxu1 %v1763_v9  ;;  %v2525_v60 = vsub.s32 1, %v683_v4 }
 0x106   : > { %574 = vadd.xlane.f32.xlu1 %v573_v59  ;;  %595 = vadd.xlane.f32.xlu0 %v594_v15  ;;  %v2530_v15 = vsub.s32 0, %v683_v4  ;;  %p1896_p2 = pnand %p1895_p1, %p1889_p5 }
 0x108   : > { %1035 = vmatpush2.bf16.msra.mxu0 %v1765_v41  ;;  %1637 = vmatpush2.bf16.msra.mxu1 %v1765_v41 }
 0x109   : > { %1036 = vmatprep.subr.bf16.mxu0 %v1766_v32  ;;  %1622 = vmatprep.subr.bf16.mxu1 %v1766_v32 }
 0x10a   : > { %598 = vadd.xlane.f32.xlu1 %v597_v20  ;;  %v724_v20 = vld [vmem:[%s2759_s4] sm:$0x3] }
 0x10c   : > { %1037 = vmatpush2.bf16.msra.mxu0 %v1768_v43  ;;  %1638 = vmatpush2.bf16.msra.mxu1 %v1768_v43 }
 0x10d   : > { %1038 = vmatprep.subr.bf16.mxu0 %v1769_v44  ;;  %1623 = vmatprep.subr.bf16.mxu1 %v1769_v44 }
 0x110   : > { %1039 = vmatpush2.bf16.msra.mxu0 %v1771_v35  ;;  %1639 = vmatpush2.bf16.msra.mxu1 %v1771_v35  ;;  %v2536_v35 = vrot.slane %v680_v61, %v2525_v60 }
 0x173   : > { %v554_v45 = vpop.xlane.xlu0 %553 }
 0x174   : > { %v600_v2 = vmul.f32 0.00390625, %v554_v45 }
 0x176   : > { %v616_v26 = vadd.f32 1e-05, %v600_v2  ;;  %v2539_v2 = vrot.slane %v680_v61, %v2530_v15 }
 0x177   : > { %v557_v31 = vpop.xlane.xlu1 %556  ;;  %v578_v56 = vpop.xlane.xlu0 %577 }
 0x178   : > { %1772 = vrsqrt.f32 %v616_v26  ;;  %v601_v3 = vmul.f32 0.00390625, %v557_v31  ;;  %v608_v0 = vmul.f32 0.00390625, %v578_v56  ;;  %v2542_v26 = vrot.slane %v724_v20, %v2525_v60 }
 0x17a   : > { %v617_v46 = vadd.f32 1e-05, %v601_v3  ;;  %v624_v49 = vadd.f32 1e-05, %v608_v0 }
 0x17b   : > { %v581_v52 = vpop.xlane.xlu1 %580  ;;  %v560_v47 = vpop.xlane.xlu0 %559 }
 0x17c   : > { %1774 = vrsqrt.f32 %v617_v46  ;;  %v609_v53 = vmul.f32 0.00390625, %v581_v52  ;;  %v602_v33 = vmul.f32 0.00390625, %v560_v47 }
 0x17d   : > { %1776 = vrsqrt.f32 %v624_v49  ;;  %v2547_v49 = vrot.slane %v724_v20, %v2530_v15 }
 0x17e   : > { %v625_v39 = vadd.f32 1e-05, %v609_v53  ;;  %v618_v16 = vadd.f32 1e-05, %v602_v33 }
 0x17f   : > { %v563_v57 = vpop.xlane.xlu1 %562  ;;  %v584_v54 = vpop.xlane.xlu0 %583 }
 0x180   : > { %1778 = vrsqrt.f32 %v625_v39  ;;  %v603_v59 = vmul.f32 0.00390625, %v563_v57  ;;  %v610_v55 = vmul.f32 0.00390625, %v584_v54 }
 0x181   : > { %1780 = vrsqrt.f32 %v618_v16 }
 0x182   : > { %v619_v19 = vadd.f32 1e-05, %v603_v59  ;;  %v626_v9 = vadd.f32 1e-05, %v610_v55 }
 0x183   : > { %v587_v41 = vpop.xlane.xlu1 %586  ;;  %v566_v32 = vpop.xlane.xlu0 %565 }
 0x184   : > { %1782 = vrsqrt.f32 %v619_v19  ;;  %v611_v43 = vmul.f32 0.00390625, %v587_v41  ;;  %v604_v44 = vmul.f32 0.00390625, %v566_v32 }
 0x185   : > { %v1773_v45 = vpop.eup %1772  ;;  %1784 = vrsqrt.f32 %v626_v9 }
 0x186   : > { %v627_v31 = vadd.f32 1e-05, %v611_v43  ;;  %v620_v56 = vadd.f32 1e-05, %v604_v44  ;;  %v649_v3 = vmul.f32 %v1773_v45, %v2324_v36  ;;  %v648_v0 = vmul.f32 %v1773_v45, %v2320_v28 }
 0x187   : > { %v569_v48 = vpop.xlane.xlu1 %568  ;;  %v590_v46 = vpop.xlane.xlu0 %589 }
 0x188   : > { %1786 = vrsqrt.f32 %v627_v31  ;;  %v605_v52 = vmul.f32 0.00390625, %v569_v48  ;;  %v612_v47 = vmul.f32 0.00390625, %v590_v46  ;;  %v693_v53 = vmul.f32 %v2536_v35, %v649_v3 }
 0x189   : > { %v1775_v33 = vpop.eup %1774  ;;  %1788 = vrsqrt.f32 %v620_v56  ;;  %v692_v4 = vmul.f32 %v2539_v2, %v648_v0 }
 0x18a   : > { %v1777_v39 = vpop.eup %1776  ;;  %v621_v16 = vadd.f32 1e-05, %v605_v52  ;;  %v628_v36 = vadd.f32 1e-05, %v612_v47  ;;  %v651_v28 = vmul.f32 %v1775_v33, %v2348_v6  ;;  %v737_v57 = vadd.f32 %v2542_v26, %v693_v53 }
 0x18b   : > { %v593_v54 = vpop.xlane.xlu1 %592  ;;  %v572_v59 = vpop.xlane.xlu0 %571  ;;  %v650_v55 = vmul.f32 %v1775_v33, %v2344_v1  ;;  %v736_v61 = vadd.f32 %v2547_v49, %v692_v4  ;;  %v665_v19 = vmul.f32 %v1777_v39, %v2332_v40  ;;  %v664_v20 = vmul.f32 %v1777_v39, %v2328_v37 }
 0x18c   : > { %1790 = vrsqrt.f32 %v621_v16  ;;  %v613_v9 = vmul.f32 0.00390625, %v593_v54  ;;  %v606_v41 = vmul.f32 0.00390625, %v572_v59  ;;  %v695_v32 = vmul.f32 %v2536_v35, %v651_v28 }
 0x18d   : > { %v1779_v43 = vpop.eup %1778  ;;  %1792 = vrsqrt.f32 %v628_v36  ;;  %v694_v6 = vmul.f32 %v2539_v2, %v650_v55  ;;  %v709_v44 = vmul.f32 %v2536_v35, %v665_v19  ;;  %v708_v45 = vmul.f32 %v2539_v2, %v664_v20 }
 0x18e   : > { %v629_v1 = vadd.f32 1e-05, %v613_v9  ;;  %v622_v31 = vadd.f32 1e-05, %v606_v41  ;;  %v739_v56 = vadd.f32 %v2542_v26, %v695_v32  ;;  %v667_v40 = vmul.f32 %v1779_v43, %v2356_v62  ;;  %v1781_v37 = vpop.eup %1780 }
 0x18f   : > { %v575_v3 = vpop.xlane.xlu1 %574  ;;  %v596_v0 = vpop.xlane.xlu0 %595  ;;  %v738_v48 = vadd.f32 %v2547_v49, %v694_v6  ;;  %v753_v46 = vadd.f32 %v2542_v26, %v709_v44  ;;  %v666_v52 = vmul.f32 %v1779_v43, %v2352_v58  ;;  %v752_v47 = vadd.f32 %v2547_v49, %v708_v45 }
 0x190   : > { %1794 = vrsqrt.f32 %v629_v1  ;;  %v607_v53 = vmul.f32 0.00390625, %v575_v3  ;;  %v614_v33 = vmul.f32 0.00390625, %v596_v0  ;;  %v769_v4 = vpack.c.bf16 %v739_v56, %v737_v57 }
 0x191   : > { %v1783_v39 = vpop.eup %1782  ;;  %1796 = vrsqrt.f32 %v622_v31  ;;  %v768_v16 = vpack.c.bf16 %v738_v48, %v736_v61  ;;  %v711_v62 = vmul.f32 %v2536_v35, %v667_v40  ;;  %v710_v36 = vmul.f32 %v2539_v2, %v666_v52 }
 0x192   : > { %v623_v28 = vadd.f32 1e-05, %v607_v53  ;;  %v630_v54 = vadd.f32 1e-05, %v614_v33  ;;  %1040 = vmatprep.mubr.bf16.mxu0 %v769_v4  ;;  %v653_v59 = vmul.f32 %v1781_v37, %v2372_v25  ;;  %v655_v58 = vmul.f32 %v1783_v39, %v2380_v50  ;;  %v1785_v9 = vpop.eup %1784 }
 0x193   : > { %v599_v55 = vpop.xlane.xlu1 %598  ;;  %1041 = vmatmul.mubr.bf16.vlgmr.msra.gmra.mxu0 %v768_v16  ;;  %v755_v19 = vadd.f32 %v2542_v26, %v711_v62  ;;  %v754_v57 = vadd.f32 %v2547_v49, %v710_v36  ;;  %v652_v20 = vmul.f32 %v1781_v37, %v2368_v12  ;;  %v654_v61 = vmul.f32 %v1783_v39, %v2376_v42 }
 0x194   : > { %1798 = vrsqrt.f32 %v623_v28  ;;  %v615_v41 = vmul.f32 0.00390625, %v599_v55  ;;  %v697_v32 = vmul.f32 %v2536_v35, %v653_v59  ;;  %v699_v43 = vmul.f32 %v2536_v35, %v655_v58 }
 0x195   : > { %v1787_v25 = vpop.eup %1786  ;;  %1800 = vrsqrt.f32 %v630_v54  ;;  %v777_v50 = vpack.c.bf16 %v755_v19, %v753_v46  ;;  %v776_v6 = vpack.c.bf16 %v754_v57, %v752_v47  ;;  %v696_v44 = vmul.f32 %v2539_v2, %v652_v20 }
 0x196   : > { %v1789_v45 = vpop.eup %1788  ;;  %v631_v1 = vadd.f32 1e-05, %v615_v41  ;;  %v741_v31 = vadd.f32 %v2542_v26, %v697_v32  ;;  %v743_v12 = vadd.f32 %v2542_v26, %v699_v43  ;;  %v698_v42 = vmul.f32 %v2539_v2, %v654_v61 }
 0x197   : > { %1080 = vmatprep.mubr.bf16.mxu1 %v777_v50  ;;  %v740_v56 = vadd.f32 %v2547_v49, %v696_v44  ;;  %v669_v40 = vmul.f32 %v1785_v9, %v2396_v5  ;;  %v671_v37 = vmul.f32 %v1787_v25, %v2404_v14  ;;  %v668_v3 = vmul.f32 %v1785_v9, %v2392_v22 }
 0x198   : > { %1802 = vrsqrt.f32 %v631_v1  ;;  %1081 = vmatmul.mubr.bf16.vlgmr.msra.gmra.mxu1 %v776_v6  ;;  %v771_v0 = vpack.c.bf16 %v743_v12, %v741_v31  ;;  %v742_v48 = vadd.f32 %v2547_v49, %v698_v42  ;;  %v670_v46 = vmul.f32 %v1787_v25, %v2400_v63 }
 0x199   : > { %v1791_v52 = vpop.eup %1790  ;;  %v713_v47 = vmul.f32 %v2536_v35, %v669_v40  ;;  %v715_v53 = vmul.f32 %v2536_v35, %v671_v37  ;;  %v712_v33 = vmul.f32 %v2539_v2, %v668_v3  ;;  %v657_v5 = vmul.f32 %v1789_v45, %v2421_v11 }
 0x19a   : > { %v1793_v4 = vpop.eup %1792  ;;  %1050 = vmatprep.mubr.bf16.mxu0 %v771_v0  ;;  %v770_v14 = vpack.c.bf16 %v742_v48, %v740_v56  ;;  %v714_v22 = vmul.f32 %v2539_v2, %v670_v46  ;;  %v659_v39 = vmul.f32 %v1791_v52, %v2429_v51  ;;  %v656_v16 = vmul.f32 %v1789_v45, %v2417_v10 }
 0x19b   : > { %v757_v63 = vadd.f32 %v2542_v26, %v713_v47  ;;  %v759_v62 = vadd.f32 %v2542_v26, %v715_v53  ;;  %v756_v36 = vadd.f32 %v2547_v49, %v712_v33  ;;  %v701_v28 = vmul.f32 %v2536_v35, %v657_v5 }
 0x19c   : > { %1051 = vmatmul.mubr.bf16.gmra.mxu0 %v770_v14  ;;  %v758_v11 = vadd.f32 %v2547_v49, %v714_v22  ;;  %v703_v54 = vmul.f32 %v2536_v35, %v659_v39  ;;  %v658_v59 = vmul.f32 %v1791_v52, %v2425_v7  ;;  %v700_v58 = vmul.f32 %v2539_v2, %v656_v16 }
 0x19d   : > { %v1795_v51 = vpop.eup %1794  ;;  %v779_v55 = vpack.c.bf16 %v759_v62, %v757_v63  ;;  %v745_v10 = vadd.f32 %v2542_v26, %v701_v28  ;;  %v673_v19 = vmul.f32 %v1793_v4, %v2446_v17  ;;  %v672_v57 = vmul.f32 %v1793_v4, %v2442_v8 }
 0x19e   : > { %v1797_v20 = vpop.eup %1796  ;;  %v778_v61 = vpack.c.bf16 %v758_v11, %v756_v36  ;;  %v747_v9 = vadd.f32 %v2542_v26, %v703_v54  ;;  %v702_v41 = vmul.f32 %v2539_v2, %v658_v59  ;;  %v744_v32 = vadd.f32 %v2547_v49, %v700_v58 }
 0x19f   : > { %1090 = vmatprep.mubr.bf16.mxu1 %v779_v55  ;;  %v675_v7 = vmul.f32 %v1795_v51, %v2454_v13  ;;  %v717_v43 = vmul.f32 %v2536_v35, %v673_v19  ;;  %v674_v25 = vmul.f32 %v1795_v51, %v2450_v21  ;;  %v716_v50 = vmul.f32 %v2539_v2, %v672_v57 }
 0x1a0   : > { %1091 = vmatmul.mubr.bf16.gmra.mxu1 %v778_v61  ;;  %v773_v17 = vpack.c.bf16 %v747_v9, %v745_v10  ;;  %v746_v8 = vadd.f32 %v2547_v49, %v702_v41  ;;  %v661_v6 = vmul.f32 %v1797_v20, %v2472_v29  ;;  %v660_v44 = vmul.f32 %v1797_v20, %v2468_v18 }
 0x1a1   : > { %v1799_v45 = vpop.eup %1798  ;;  %v719_v1 = vmul.f32 %v2536_v35, %v675_v7  ;;  %v761_v31 = vadd.f32 %v2542_v26, %v717_v43  ;;  %v718_v13 = vmul.f32 %v2539_v2, %v674_v25  ;;  %v760_v12 = vadd.f32 %v2547_v49, %v716_v50 }
 0x1a2   : > { %v1801_v21 = vpop.eup %1800  ;;  %1060 = vmatprep.mubr.bf16.mxu0 %v773_v17  ;;  %v772_v42 = vpack.c.bf16 %v746_v8, %v744_v32  ;;  %v663_v56 = vmul.f32 %v1799_v45, %v2480_v23  ;;  %v705_v40 = vmul.f32 %v2536_v35, %v661_v6  ;;  %v662_v29 = vmul.f32 %v1799_v45, %v2476_v30 }
 0x1a3   : > { %v763_v18 = vadd.f32 %v2542_v26, %v719_v1  ;;  %v762_v37 = vadd.f32 %v2547_v49, %v718_v13  ;;  %v704_v3 = vmul.f32 %v2539_v2, %v660_v44  ;;  %v677_v0 = vmul.f32 %v1801_v21, %v2498_v34 }
 0x1a4   : > { %1061 = vmatmul.mubr.bf16.gmra.mxu0 %v772_v42  ;;  %v707_v48 = vmul.f32 %v2536_v35, %v663_v56  ;;  %v749_v46 = vadd.f32 %v2542_v26, %v705_v40  ;;  %v706_v52 = vmul.f32 %v2539_v2, %v662_v29  ;;  %v676_v23 = vmul.f32 %v1801_v21, %v2494_v24 }
 0x1a5   : > { %v1803_v47 = vpop.eup %1802  ;;  %v781_v53 = vpack.c.bf16 %v763_v18, %v761_v31  ;;  %v780_v30 = vpack.c.bf16 %v762_v37, %v760_v12  ;;  %v748_v33 = vadd.f32 %v2547_v49, %v704_v3  ;;  %v721_v5 = vmul.f32 %v2536_v35, %v677_v0 }
 0x1a6   : > { %v751_v4 = vadd.f32 %v2542_v26, %v707_v48  ;;  %v750_v34 = vadd.f32 %v2547_v49, %v706_v52  ;;  %v679_v14 = vmul.f32 %v1803_v47, %v2506_v27  ;;  %v678_v22 = vmul.f32 %v1803_v47, %v2502_v38 }
 0x1a7   : > { %1100 = vmatprep.mubr.bf16.mxu1 %v781_v53  ;;  %v720_v39 = vmul.f32 %v2539_v2, %v676_v23  ;;  %v765_v36 = vadd.f32 %v2542_v26, %v721_v5 }
 0x1a8   : > { %1101 = vmatmul.mubr.bf16.gmra.mxu1 %v780_v30  ;;  %v775_v24 = vpack.c.bf16 %v751_v4, %v749_v46  ;;  %v774_v16 = vpack.c.bf16 %v750_v34, %v748_v33  ;;  %v723_v63 = vmul.f32 %v2536_v35, %v679_v14  ;;  %v722_v62 = vmul.f32 %v2539_v2, %v678_v22  ;;  %v1220_v35 = vld [vmem:[%s300_s7] sm:$0x3] }
 0x1a9   : > { %v764_v27 = vadd.f32 %v2547_v49, %v720_v39  ;;  %v2645_v2 = vrot.slane %v1220_v35, %v2530_v15  ;;  %v2648_v59 = vrot.slane %v1220_v35, %v2525_v60 }
 0x1aa   : > { %1070 = vmatprep.mubr.bf16.mxu0 %v775_v24  ;;  %v767_v28 = vadd.f32 %v2542_v26, %v723_v63  ;;  %v766_v38 = vadd.f32 %v2547_v49, %v722_v62 }
 0x1ac   : > { %1071 = vmatmul.mubr.bf16.gmra.mxu0 %v774_v16  ;;  %v783_v11 = vpack.c.bf16 %v767_v28, %v765_v36  ;;  %v782_v54 = vpack.c.bf16 %v766_v38, %v764_v27 }
 0x1ae   : > { %1110 = vmatprep.mubr.bf16.mxu1 %v783_v11 }
 0x1b0   : > { %1111 = vmatmul.mubr.bf16.gmra.mxu1 %v782_v54 }
 0x253   : > { %v1042_v58 = vpop.f32.mrf.mxu0 }
 0x254   : > { %v1232_v51 = vadd.f32 %v2645_v2, %v1042_v58 }
 0x255   : > { %v1044_v26 = vpop.f32.mrf.mxu0 }
 0x256   : > { %v1233_v49 = vadd.f32 %v2648_v59, %v1044_v26 }
 0x257   : > { %v1046_v55 = vpop.f32.mrf.mxu0 }
 0x258   : > { %v1591_v10 = vpack.c.bf16 %v1233_v49, %v1232_v51  ;;  %v1082_v19 = vpop.f32.mrf.mxu1  ;;  %v1234_v60 = vadd.f32 %v2645_v2, %v1046_v55 }
 0x259   : > { %v1048_v57 = vpop.f32.mrf.mxu0  ;;  %v1248_v61 = vadd.f32 %v2645_v2, %v1082_v19 }
 0x25a   : > { %1360 = vst [vmem:[%s2653_s15] sm:$0xff] %v1591_v10  ;;  %v1235_v15 = vadd.f32 %v2648_v59, %v1048_v57  ;;  %v1084_v20 = vpop.f32.mrf.mxu1 }
 0x25b   : > { %v1249_v9 = vadd.f32 %v2648_v59, %v1084_v20 }
 0x25c   : > { %v1592_v41 = vpack.c.bf16 %v1235_v15, %v1234_v60  ;;  %v1052_v32 = vpop.f32.mrf.mxu0  ;;  %v1086_v7 = vpop.f32.mrf.mxu1 }
 0x25d   : > { %v1599_v43 = vpack.c.bf16 %v1249_v9, %v1248_v61  ;;  %v1236_v17 = vadd.f32 %v2645_v2, %v1052_v32  ;;  %v1250_v8 = vadd.f32 %v2645_v2, %v1086_v7 }
 0x25e   : > { %1361 = vst [vmem:[%s2653_s15 + $0x8] sm:$0xff] %v1592_v41  ;;  %v1054_v25 = vpop.f32.mrf.mxu0  ;;  %v1088_v50 = vpop.f32.mrf.mxu1 }
 0x25f   : > { %1368 = vst [vmem:[%s2653_s15 + $0x40] sm:$0xff] %v1599_v43  ;;  %v1237_v6 = vadd.f32 %v2648_v59, %v1054_v25  ;;  %v1251_v44 = vadd.f32 %v2648_v59, %v1088_v50 }
 0x260   : > { %v1056_v45 = vpop.f32.mrf.mxu0  ;;  %v1092_v1 = vpop.f32.mrf.mxu1 }
 0x261   : > { %v1593_v31 = vpack.c.bf16 %v1237_v6, %v1236_v17  ;;  %v1600_v13 = vpack.c.bf16 %v1251_v44, %v1250_v8  ;;  %v1238_v42 = vadd.f32 %v2645_v2, %v1056_v45  ;;  %v1252_v56 = vadd.f32 %v2645_v2, %v1092_v1 }
 0x262   : > { %v1058_v12 = vpop.f32.mrf.mxu0  ;;  %v1094_v21 = vpop.f32.mrf.mxu1 }
 0x263   : > { %1362 = vst [vmem:[%s2653_s15 + $0x10] sm:$0xff] %v1593_v31  ;;  %1369 = vst [vmem:[%s2653_s15 + $0x48] sm:$0xff] %v1600_v13  ;;  %v1239_v40 = vadd.f32 %v2648_v59, %v1058_v12  ;;  %v1253_v29 = vadd.f32 %v2648_v59, %v1094_v21 }
 0x264   : > { %v1062_v18 = vpop.f32.mrf.mxu0  ;;  %v1096_v37 = vpop.f32.mrf.mxu1 }
 0x265   : > { %v1594_v3 = vpack.c.bf16 %v1239_v40, %v1238_v42  ;;  %v1601_v0 = vpack.c.bf16 %v1253_v29, %v1252_v56  ;;  %v1240_v52 = vadd.f32 %v2645_v2, %v1062_v18  ;;  %v1254_v23 = vadd.f32 %v2645_v2, %v1096_v37 }
 0x266   : > { %v1064_v48 = vpop.f32.mrf.mxu0  ;;  %v1098_v46 = vpop.f32.mrf.mxu1 }
 0x267   : > { %1363 = vst [vmem:[%s2653_s15 + $0x18] sm:$0xff] %v1594_v3  ;;  %1370 = vst [vmem:[%s2653_s15 + $0x50] sm:$0xff] %v1601_v0  ;;  %v1241_v47 = vadd.f32 %v2648_v59, %v1064_v48  ;;  %v1255_v53 = vadd.f32 %v2648_v59, %v1098_v46 }
 0x268   : > { %v1066_v30 = vpop.f32.mrf.mxu0  ;;  %v1102_v33 = vpop.f32.mrf.mxu1 }
 0x269   : > { %v1595_v5 = vpack.c.bf16 %v1241_v47, %v1240_v52  ;;  %v1602_v4 = vpack.c.bf16 %v1255_v53, %v1254_v23  ;;  %v1242_v22 = vadd.f32 %v2645_v2, %v1066_v30  ;;  %v1256_v39 = vadd.f32 %v2645_v2, %v1102_v33 }
 0x26a   : > { %v1068_v34 = vpop.f32.mrf.mxu0  ;;  %v1104_v14 = vpop.f32.mrf.mxu1 }
 0x26b   : > { %1364 = vst [vmem:[%s2653_s15 + $0x20] sm:$0xff] %v1595_v5  ;;  %1371 = vst [vmem:[%s2653_s15 + $0x58] sm:$0xff] %v1602_v4  ;;  %v1243_v24 = vadd.f32 %v2648_v59, %v1068_v34  ;;  %v1257_v16 = vadd.f32 %v2648_v59, %v1104_v14 }
 0x26c   : > { %v1072_v63 = vpop.f32.mrf.mxu0  ;;  %v1106_v62 = vpop.f32.mrf.mxu1 }
 0x26d   : > { %v1596_v36 = vpack.c.bf16 %v1243_v24, %v1242_v22  ;;  %v1603_v28 = vpack.c.bf16 %v1257_v16, %v1256_v39  ;;  %v1244_v11 = vadd.f32 %v2645_v2, %v1072_v63  ;;  %v1258_v54 = vadd.f32 %v2645_v2, %v1106_v62 }
 0x26e   : > { %v1074_v27 = vpop.f32.mrf.mxu0  ;;  %v1108_v38 = vpop.f32.mrf.mxu1 }
 0x26f   : > { %1365 = vst [vmem:[%s2653_s15 + $0x28] sm:$0xff] %v1596_v36  ;;  %1372 = vst [vmem:[%s2653_s15 + $0x60] sm:$0xff] %v1603_v28  ;;  %v1245_v35 = vadd.f32 %v2648_v59, %v1074_v27  ;;  %v1259_v58 = vadd.f32 %v2648_v59, %v1108_v38 }
 0x270   : > { %v1076_v26 = vpop.f32.mrf.mxu0  ;;  %v1112_v51 = vpop.f32.mrf.mxu1 }
 0x271   : > { %v1597_v49 = vpack.c.bf16 %v1245_v35, %v1244_v11  ;;  %v1604_v55 = vpack.c.bf16 %v1259_v58, %v1258_v54  ;;  %v1246_v57 = vadd.f32 %v2645_v2, %v1076_v26  ;;  %v1260_v60 = vadd.f32 %v2645_v2, %v1112_v51 }
 0x272   : > { %v1078_v10 = vpop.f32.mrf.mxu0  ;;  %v1114_v19 = vpop.f32.mrf.mxu1 }
 0x273   : > { %1366 = vst [vmem:[%s2653_s15 + $0x30] sm:$0xff] %v1597_v49  ;;  %1373 = vst [vmem:[%s2653_s15 + $0x68] sm:$0xff] %v1604_v55  ;;  %v1247_v15 = vadd.f32 %v2648_v59, %v1078_v10  ;;  %v1261_v20 = vadd.f32 %v2648_v59, %v1114_v19 }
 0x274   : > { %v1116_v61 = vpop.f32.mrf.mxu1 }
 0x275   : > { %v1598_v9 = vpack.c.bf16 %v1247_v15, %v1246_v57  ;;  %v1605_v41 = vpack.c.bf16 %v1261_v20, %v1260_v60  ;;  %v1262_v7 = vadd.f32 %v2645_v2, %v1116_v61 }
 0x276   : > { %v1118_v32 = vpop.f32.mrf.mxu1 }
 0x277   : > { %1367 = vst [vmem:[%s2653_s15 + $0x38] sm:$0xff] %v1598_v9  ;;  %1374 = vst [vmem:[%s2653_s15 + $0x70] sm:$0xff] %v1605_v41  ;;  %v1263_v43 = vadd.f32 %v2648_v59, %v1118_v32 }
 0x279   : > { %v1606_v25 = vpack.c.bf16 %v1263_v43, %v1262_v7 }
 0x27b   : > { %1375 = vst [vmem:[%s2653_s15 + $0x78] sm:$0xff] %v1606_v25 }
 0x27c   : > { %1899 = shalt.err (!%p1896_p2)
}
 0x27d   : > { %s1900_s6 = scalar_lea.hbm %s2705_s13, 2048  ;;  %s1904_s16 = scalar_lea.hbm %s2760_s5, 6144 }
 0x27e   : > { %p1901_p4 = scmp.ne.s32.totalorder %s2705_s13, %s1900_s6  ;;  %p1905_p6 = scmp.lt.s32.totalorder %s2705_s13, %s2760_s5 }
 0x27f   : > { %p1906_p3 = scmp.lt.s32.totalorder %s1904_s16, %s1900_s6 }
 0x280   : > { %p1902_p9 = pnand %p1901_p4, %p2784_p13 }
 0x281   : > { %p1907_p8 = por %p1906_p3, %p1905_p6 }
 0x282   : > { %p1903_p11 = pneg %p1902_p9 }
 0x284   : > { %p1908_p10 = pnand %p1907_p8, %p1903_p11 }
 0x286   : > { %1911 = shalt.err (!%p1908_p10)
}
 0x287   : > { %s1979_s29 = smov 128   ;;  %s1980_s15 = smov 384  }
 0x288   : > { %s1981_s27 = smov 8  }
 0x289   : > { %1648 = dma.vmem_to_hbm [thread:$0]  (%p2784_p13), %s2707_s1, 2048, %s2705_s13, %s1377_s21, %s1979_s29, %s1980_s15, %s1981_s27  }
 0x28a PF: > { %p1668_p0 = scmp.ge.s32.totalorder %s1970_s23, 2  ;;  %s1408_s22 = sand.u32 1, %s1950_s18  }
 0x28b   : > { %p2785_p5 = scmp.ne.s32.totalorder %s2776_s10, 0  ;;  %s1409_s24 = scalar_lea.sflag [#allocation5], %s1408_s22 }
 0x28d   : > { %p1662_p12 = pnand %p1668_p0, %p2785_p5 }
 0x28f   : > { %p1663_p7 = pneg %p1662_p12 }
 0x291   : > { %1945 = dma.done.wait (%p1663_p7), %s1409_s24, 2048  }
 0x292   : > { %1947 = vsyncadd (%p1663_p7), %s1409_s24, 4294965248  ;;  %s22_s23 = sadd.s32 1, %s1970_s23   ;;  %s2786_s21 = sld [smem:[#allocation13_spill]] }
 0x293   : > { %p19_p1 = scmp.ge.s32.totalorder %s22_s23, 5   ;;  %s2787_s22 = sld [smem:[#allocation14_spill]] }
 0x294   : > { %s2788_s18 = smov %s1954_s19  ;;  %s2789_s19 = smov %s1958_s20 }
 0x295   : > { %s2790_s20 = smov %s2062_s30  ;;  %21 = sbr.rel (!%p19_p1) target bundleno = 9 (0x9), region = 110 }
 0x29a   :  { %1414 = vsyncpa [#allocation4], 1 }
 0x29b   :  { %1416 = vsyncpa [#allocation4 + $0x1], 1 }
 0x29c   :  { %1417 = vsyncpa [#allocation7], 1 }
 0x29d   :  { %1419 = vsyncpa [#allocation7 + $0x1], 1 }
 0x29e   :  { %1420 = vsyncpa [#allocation5], 1 }
 0x29f   :  { %1422 = vsyncpa [#allocation5 + $0x1], 1 }

</bundles_post_ra>
